<compile_context>
chip_gen: v7x
topology: tpu7x:2x2x1
jax: 0.10.0
libtpu: 0.0.40
codegen_flags: <defaults>
</compile_context>

<pallas_src>
import functools

import numpy as np
import jax
import jax.numpy as jnp
from jax import lax
from jax.experimental import pallas as pl
from jax.experimental.pallas import tpu as pltpu


def _mlm_kernel(seqlen_ref, maskstart_ref, attn_out_ref, cand_out_ref,
                *, verbalizers):
    """seqlen_ref    : VMEM int32[Bt, 1]  per-example real length
       maskstart_ref : VMEM int32[Bt, 1]  per-example index of first [MASK]
       attn_out_ref  : VMEM int8 [Bt, L]
       cand_out_ref  : VMEM int32[Bt, V, L]
       verbalizers   : static tuple of tuples of ints (trace-time constants)
    """
    Bt, L = attn_out_ref.shape

    # Single hoisted iota reused for the padding mask and candidate placement.
    pos = lax.broadcasted_iota(jnp.int32, (Bt, L), 1)        # [Bt, L]
    valid = pos < seqlen_ref[...]                             # [Bt, L]
    attn_out_ref[...] = valid.astype(jnp.int8)

    # rel[b, l] = l - mask_start_b ; verbalizer token j of row v lands where
    # rel == j.  Tokens are trace-time constants -> scalar-splat selects only.
    rel = pos - maskstart_ref[...]                             # [Bt, L]
    neg100 = jnp.full((Bt, L), -100, dtype=jnp.int32)
    for v, tokens in enumerate(verbalizers):                   # few, static
        row = neg100
        for j, tok in enumerate(tokens):                       # short, static
            row = jnp.where(rel == j, jnp.int32(int(tok)), row)
        cand_out_ref[:, v, :] = row                            # 2D store per row


def _choose_block_rows(batch, max_rows=512):
    """Generation-dependent row-block size.

    v7x has 2 TensorCores -> keep >=2 grid steps so ("parallel",) shards them.
    v5e/v6e have 1 TC -> minimize step count (per-step overhead ~0.35us).
    Always a multiple of 32 (int8 min tile is (32, 128)).
    """
    try:
        dual_tc = "v7" in jax.devices()[0].device_kind.lower()
    except Exception:  # pragma: no cover - be robust off-TPU
        dual_tc = False
    min_steps = 2 if dual_tc else 1
    best = 32
    for br in range(32, min(batch, max_rows) + 1, 32):
        if batch % br == 0 and batch // br >= min_steps:
            best = br
    return best


def mlm_process(seq_lens, mask_starts, tokenized_verbalizers, max_seq_length):
    """seq_lens: int32[B,1]; mask_starts: int32[B,1].

    Returns (attention_mask int8[B,L], candidates_ids int32[B,V,L]).
    The (host-padded) input_ids array is returned by the caller directly.
    """
    B = seq_lens.shape[0]
    L = int(max_seq_length)
    verbalizers = tuple(tuple(int(t) for t in v[0]) for v in tokenized_verbalizers)
    V = len(verbalizers)
    assert L % 128 == 0, "pad max_seq_length to a multiple of 128 lanes"
    assert B % 32 == 0, "batch must be a multiple of 32 (int8 tile)"
    # a genuine -100 verbalizer token would be indistinguishable from padding
    assert all(t != -100 for row in verbalizers for t in row)

    block_rows = _choose_block_rows(B)
    kernel = functools.partial(_mlm_kernel, verbalizers=verbalizers)
    grid = (B // block_rows,)

    return pl.pallas_call(
        kernel,
        out_shape=(
            jax.ShapeDtypeStruct((B, L), jnp.int8),        # attention_mask
            jax.ShapeDtypeStruct((B, V, L), jnp.int32),    # candidates_ids
        ),
        grid_spec=pltpu.PrefetchScalarGridSpec(
            num_scalar_prefetch=0,
            grid=grid,
            in_specs=[
                pl.BlockSpec((block_rows, 1), lambda i: (i, 0)),
                pl.BlockSpec((block_rows, 1), lambda i: (i, 0)),
            ],
            out_specs=(
                pl.BlockSpec((block_rows, L), lambda i: (i, 0)),
                pl.BlockSpec((block_rows, V, L), lambda i: (i, 0, 0)),
            ),
        ),
        compiler_params=pltpu.CompilerParams(
            dimension_semantics=("parallel",)),
    )(seq_lens, mask_starts)


# ---------------------------------------------------------------------------
# Host-side glue emulating tokenizer/processor (deterministic, synthetic).
# ---------------------------------------------------------------------------
def build_batch(key, batch, max_seq_length, tokenized_verbalizers,
                mask_token_id, pad_token_id, cls_id=1, sep_id=2):
    mask_length = max(len(t[0]) for t in tokenized_verbalizers)
    keys = jax.random.split(key, batch)
    # Host pre-fills with pad_token_id -> the kernel need not re-emit input_ids.
    padded_ids = np.full((batch, max_seq_length), pad_token_id, dtype=np.int32)
    seq_lens = np.zeros((batch, 1), dtype=np.int32)
    mask_starts = np.zeros((batch, 1), dtype=np.int32)
    py_inputs = []
    for b in range(batch):
        n_text = 6 + (b % 20)  # deterministic, variable per-example length
        toks = np.asarray(jax.random.randint(
            keys[b], (n_text,), 3, 900, dtype=jnp.int32)).tolist()
        # build_inputs_with_special_tokens: [CLS] text [MASK]*mask_length [SEP]
        input_ids = [cls_id] + toks + [mask_token_id] * mask_length + [sep_id]
        assert len(input_ids) <= max_seq_length  # "truncate" already satisfied
        padded_ids[b, :len(input_ids)] = input_ids
        seq_lens[b, 0] = len(input_ids)
        # Same Python list op as the original module (raises if [MASK] absent).
        mask_starts[b, 0] = input_ids.index(mask_token_id)
        py_inputs.append(input_ids)
    return (padded_ids, jnp.asarray(seq_lens), jnp.asarray(mask_starts),
            py_inputs)


def reference_forward(input_ids, max_seq_length, tokenized_verbalizers,
                      mask_token_id, pad_token_id):
    """Direct port of the tail of MLMProcessor.forward (Python lists)."""
    input_ids = list(input_ids)
    attention_mask = [1] * len(input_ids)
    n_mask = max_seq_length - len(input_ids)
    input_ids = input_ids + [pad_token_id] * n_mask
    attention_mask = attention_mask + [0] * n_mask
    candidates_ids = []
    mask_start = input_ids.index(mask_token_id)
    for verbalizers_list in tokenized_verbalizers:
        tokens = verbalizers_list[0]
        candidate_ids = [-100] * len(input_ids)
        mask_end = mask_start + len(tokens)
        candidate_ids[mask_start:mask_end] = tokens
        candidates_ids.append(candidate_ids)
    return (np.array(input_ids, np.int32),
            np.array(attention_mask, np.int32),
            np.array(candidates_ids, np.int32))


if __name__ == "__main__":
    key = jax.random.PRNGKey(0)
    batch = 64                       # many examples per pallas_call
    max_seq_length = 128             # lane-dense last dim
    mask_token_id = 999
    pad_token_id = 0
    tokenized_verbalizers = [[[101, 102]], [[201]], [[301, 302]]]  # 3 classes

    padded_ids, seq_lens, mask_starts, py_inputs = build_batch(
        key, batch, max_seq_length, tokenized_verbalizers,
        mask_token_id, pad_token_id)

    attn_out, cand_out = mlm_process(
        seq_lens, mask_starts, tokenized_verbalizers, max_seq_length)
    jax.block_until_ready((attn_out, cand_out))

    attn_np = np.asarray(attn_out).astype(np.int32)  # int8 on-device; cast here
    cand_np = np.asarray(cand_out)
    V = len(tokenized_verbalizers)
    assert cand_np.shape == (batch, V, max_seq_length)

    # correctness: compare every example against a direct port of the PyTorch logic
    for b in range(batch):
        ref_ids, ref_attn, ref_cand = reference_forward(
            py_inputs[b], max_seq_length, tokenized_verbalizers,
            mask_token_id, pad_token_id)
        np.testing.assert_array_equal(padded_ids[b], ref_ids)
        np.testing.assert_array_equal(attn_np[b], ref_attn)
        np.testing.assert_array_equal(cand_np[b], ref_cand)

    print("KERNEL_OK")
</pallas_src>

<mosaic_0001>
module attributes {stable_mosaic.version = 11 : i64} {
  func.func @_mlm_kernel(%arg0: i32, %arg1: memref<64x1xi32, #tpu.memory_space<vmem>>, %arg2: memref<64x1xi32, #tpu.memory_space<vmem>>, %arg3: memref<64x128xi8, #tpu.memory_space<vmem>>, %arg4: memref<64x3x128xi32, #tpu.memory_space<vmem>>) attributes {dimension_semantics = [#tpu.dimension_semantics<parallel>], iteration_bounds = array<i64: 1>, scalar_prefetch = 0 : i64, scratch_operands = 0 : i64, tpu.core_type = #tpu.core_type<tc>, window_params = [{transform_indices = @transform_0, window_bounds = array<i64: 64, 1>}, {transform_indices = @transform_1, window_bounds = array<i64: 64, 1>}, {transform_indices = @transform_2, window_bounds = array<i64: 64, 128>}, {transform_indices = @transform_3, window_bounds = array<i64: 64, 3, 128>}]} {
    %0 = tpu.iota {dimensions = array<i32: 1>} : vector<64x128xi32>
    %c0 = arith.constant 0 : index
    %c0_0 = arith.constant 0 : index
    %1 = vector.load %arg1[%c0, %c0_0] : memref<64x1xi32, #tpu.memory_space<vmem>>, vector<64x1xi32>
    %2 = vector.broadcast %1 : vector<64x1xi32> to vector<64x128xi32>
    %3 = arith.cmpi slt, %0, %2 : vector<64x128xi32>
    %4 = arith.extui %3 : vector<64x128xi1> to vector<64x128xi8>
    %c0_1 = arith.constant 0 : index
    %c0_2 = arith.constant 0 : index
    %5 = vector.load %arg3[%c0_1, %c0_2] : memref<64x128xi8, #tpu.memory_space<vmem>>, vector<64x128xi8>
    tpu.vector_store %arg3[%c0_1, %c0_2], %4 {strides = array<i32>} : memref<64x128xi8, #tpu.memory_space<vmem>>, vector<64x128xi8>,
    %c0_3 = arith.constant 0 : index
    %c0_4 = arith.constant 0 : index
    %6 = vector.load %arg2[%c0_3, %c0_4] : memref<64x1xi32, #tpu.memory_space<vmem>>, vector<64x1xi32>
    %7 = vector.broadcast %6 : vector<64x1xi32> to vector<64x128xi32>
    %8 = arith.subi %0, %7 : vector<64x128xi32>
    %c-100_i32 = arith.constant -100 : i32
    %9 = vector.broadcast %c-100_i32 : i32 to vector<64x128xi32>
    %c0_i32 = arith.constant 0 : i32
    %10 = vector.broadcast %c0_i32 : i32 to vector<64x128xi32>
    %11 = arith.cmpi eq, %8, %10 : vector<64x128xi32>
    %c101_i32 = arith.constant 101 : i32
    %12 = vector.broadcast %c101_i32 : i32 to vector<64x128xi32>
    %13 = arith.select %11, %12, %9 : vector<64x128xi1>, vector<64x128xi32>
    %c1_i32 = arith.constant 1 : i32
    %14 = vector.broadcast %c1_i32 : i32 to vector<64x128xi32>
    %15 = arith.cmpi eq, %8, %14 : vector<64x128xi32>
    %c102_i32 = arith.constant 102 : i32
    %16 = vector.broadcast %c102_i32 : i32 to vector<64x128xi32>
    %17 = arith.select %15, %16, %13 : vector<64x128xi1>, vector<64x128xi32>
    %c0_5 = arith.constant 0 : index
    %c0_6 = arith.constant 0 : index
    %c0_7 = arith.constant 0 : index
    %18 = vector.load %arg4[%c0_5, %c0_6, %c0_7] : memref<64x3x128xi32, #tpu.memory_space<vmem>>, vector<64x1x128xi32>
    %19 = vector.shape_cast %18 : vector<64x1x128xi32> to vector<64x128xi32>
    %20 = vector.shape_cast %17 : vector<64x128xi32> to vector<64x1x128xi32>
    tpu.vector_store %arg4[%c0_5, %c0_6, %c0_7], %20 {strides = array<i32>} : memref<64x3x128xi32, #tpu.memory_space<vmem>>, vector<64x1x128xi32>,
    %c0_i32_8 = arith.constant 0 : i32
    %21 = vector.broadcast %c0_i32_8 : i32 to vector<64x128xi32>
    %22 = arith.cmpi eq, %8, %21 : vector<64x128xi32>
    %c201_i32 = arith.constant 201 : i32
    %23 = vector.broadcast %c201_i32 : i32 to vector<64x128xi32>
    %24 = arith.select %22, %23, %9 : vector<64x128xi1>, vector<64x128xi32>
    %c0_9 = arith.constant 0 : index
    %c1 = arith.constant 1 : index
    %c0_10 = arith.constant 0 : index
    %25 = vector.load %arg4[%c0_9, %c1, %c0_10] : memref<64x3x128xi32, #tpu.memory_space<vmem>>, vector<64x1x128xi32>
    %26 = vector.shape_cast %25 : vector<64x1x128xi32> to vector<64x128xi32>
    %27 = vector.shape_cast %24 : vector<64x128xi32> to vector<64x1x128xi32>
    tpu.vector_store %arg4[%c0_9, %c1, %c0_10], %27 {strides = array<i32>} : memref<64x3x128xi32, #tpu.memory_space<vmem>>, vector<64x1x128xi32>,
    %c0_i32_11 = arith.constant 0 : i32
    %28 = vector.broadcast %c0_i32_11 : i32 to vector<64x128xi32>
    %29 = arith.cmpi eq, %8, %28 : vector<64x128xi32>
    %c301_i32 = arith.constant 301 : i32
    %30 = vector.broadcast %c301_i32 : i32 to vector<64x128xi32>
    %31 = arith.select %29, %30, %9 : vector<64x128xi1>, vector<64x128xi32>
    %c1_i32_12 = arith.constant 1 : i32
    %32 = vector.broadcast %c1_i32_12 : i32 to vector<64x128xi32>
    %33 = arith.cmpi eq, %8, %32 : vector<64x128xi32>
    %c302_i32 = arith.constant 302 : i32
    %34 = vector.broadcast %c302_i32 : i32 to vector<64x128xi32>
    %35 = arith.select %33, %34, %31 : vector<64x128xi1>, vector<64x128xi32>
    %c0_13 = arith.constant 0 : index
    %c2 = arith.constant 2 : index
    %c0_14 = arith.constant 0 : index
    %36 = vector.load %arg4[%c0_13, %c2, %c0_14] : memref<64x3x128xi32, #tpu.memory_space<vmem>>, vector<64x1x128xi32>
    %37 = vector.shape_cast %36 : vector<64x1x128xi32> to vector<64x128xi32>
    %38 = vector.shape_cast %35 : vector<64x128xi32> to vector<64x1x128xi32>
    tpu.vector_store %arg4[%c0_13, %c2, %c0_14], %38 {strides = array<i32>} : memref<64x3x128xi32, #tpu.memory_space<vmem>>, vector<64x1x128xi32>,
    return
  }
  func.func @transform_0(%arg0: i32) -> (i32, i32) {
    %c0_i32 = arith.constant 0 : i32
    %c0_i32_0 = arith.constant 0 : i32
    return %arg0, %c0_i32 : i32, i32
  }
  func.func @transform_1(%arg0: i32) -> (i32, i32) {
    %c0_i32 = arith.constant 0 : i32
    %c0_i32_0 = arith.constant 0 : i32
    return %arg0, %c0_i32 : i32, i32
  }
  func.func @transform_2(%arg0: i32) -> (i32, i32) {
    %c0_i32 = arith.constant 0 : i32
    %c0_i32_0 = arith.constant 0 : i32
    return %arg0, %c0_i32 : i32, i32
  }
  func.func @transform_3(%arg0: i32) -> (i32, i32, i32) {
    %c0_i32 = arith.constant 0 : i32
    %c0_i32_0 = arith.constant 0 : i32
    %c0_i32_1 = arith.constant 0 : i32
    return %arg0, %c0_i32, %c0_i32_0 : i32, i32, i32
  }
}

</mosaic_0001>

<bundles_post_ra>
// kernel: tpu_custom_call.1
= control target key start
LH: loop header
LB: loop body
LE: loop exit
PB: predicated region body
PF: predicated region fallthrough
CT: control target
= control target key end

     0   :  { %v1680_v2 = vmov 0   ;;  %s2647_s0 = inlined_call_operand.vmem [shape: s32[64,1], index: 0, kind: input, shape index: {}]   ;;  %s2648_s1 = inlined_call_operand.vmem [shape: s32[64,1], index: 1, kind: input, shape index: {}]   ;;  %s2649_s2 = inlined_call_operand.hbm [shape: s8[64,128], index: 2, kind: output, shape index: {0}]   ;;  %s2650_s3 = inlined_call_operand.vmem [shape: s32[64,3,128], index: 3, kind: output, shape index: {1}]  }
   0x1   :  { %v70_v0 = vld [vmem:[%s2648_s1 + $0x10] sm:$0xff]  ;;  %v68_v1 = vld [vmem:[%s2648_s1] sm:$0xff]  ;;  %1655 = vset.pattern.permute.xlu1 %v1680_v2  ;;  %1654 = vset.pattern.permute.xlu0 %v1680_v2  ;;  %v71_v3 = vld [vmem:[%s2648_s1 + $0x18] sm:$0xff] }
   0x2   :  { %83 = vperm.xlu1 %1655, %v70_v0   ;;  %77 = vperm.xlu0 %1654, %v68_v1   ;;  %v69_v4 = vld [vmem:[%s2648_s1 + $0x8] sm:$0xff] }
   0x3   :  { %9 = vsyncpa [#allocation3], 0  ;;  %v73_v5 = vld [vmem:[%s2648_s1 + $0x28] sm:$0xff]  ;;  %v72_v6 = vld [vmem:[%s2648_s1 + $0x20] sm:$0xff]  ;;  %v1681_v17 = vmov 1966171168   ;;  %v16_v19 = vlaneseq }
   0x4   :  { %v75_v7 = vld [vmem:[%s2648_s1 + $0x38] sm:$0xff]  ;;  %v74_v8 = vld [vmem:[%s2648_s1 + $0x30] sm:$0xff]  ;;  %v19_v9 = vld [vmem:[%s2647_s0 + $0x8] sm:$0xff]  ;;  %v142_v18 = vunpack.c.l.s4 %v1681_v17  ;;  %v1682_v28 = vmov 4294967196   ;;  %s1683_s9 = smov [#allocation2]  }
   0x5   :  { %v18_v10 = vld [vmem:[%s2647_s0] sm:$0xff]  ;;  %v21_v11 = vld [vmem:[%s2647_s0 + $0x18] sm:$0xff]  ;;  %v20_v12 = vld [vmem:[%s2647_s0 + $0x10] sm:$0xff]  ;;  %v1756_v21 = vand.u32 127, %v16_v19  ;;  %v145_v22 = vshrl.u32 %v16_v19, 7  ;;  %s1537_s10 = sshll.u32 %s1683_s9, 4  ;;  %s1538_s10 = int_to_ptr.vmem [resolvable:$true] %s1537_s10 }
   0x6   :  { %86 = vperm.xlu1 %1655, %v71_v3   ;;  %80 = vperm.xlu0 %1654, %v69_v4   ;;  %v23_v13 = vld [vmem:[%s2647_s0 + $0x28] sm:$0xff]  ;;  %v22_v14 = vld [vmem:[%s2647_s0 + $0x20] sm:$0xff]  ;;  %v25_v15 = vld [vmem:[%s2647_s0 + $0x38] sm:$0xff]  ;;  %v143_v20 = vunpack.c.0.s8 %v142_v18  ;;  %s1656_s22 = scalar_lea.vmem %s1538_s10, 256  ;;  %p1661_p1 = scmp.lt.s32.totalorder %s1538_s10, %s1538_s10 }
   0x7   :  { %v24_v16 = vld [vmem:[%s2647_s0 + $0x30] sm:$0xff]  ;;  %p1657_p0 = scmp.ne.s32.totalorder %s1538_s10, %s1656_s22  ;;  %p1662_p2 = scmp.lt.s32.totalorder %s1656_s22, %s1656_s22 }
   0x8   :  { %v1759_v26 = vsub.s32 %v143_v20, %v145_v22 }
   0x9   :  { %p1663_p3 = por %p1662_p2, %p1661_p1 }
   0xa   :  { %92 = vperm.xlu1 %1655, %v73_v5   ;;  %89 = vperm.xlu0 %1654, %v72_v6  }
   0xb   :  { %p1664_p4 = pnand %p1663_p3, %p1657_p0 }
   0xe   :  { %98 = vperm.xlu1 %1655, %v75_v7   ;;  %95 = vperm.xlu0 %1654, %v74_v8  }
  0x12   :  { %30 = vperm.xlu1 %1655, %v19_v9   ;;  %27 = vperm.xlu0 %1654, %v18_v10  }
  0x16   :  { %36 = vperm.xlu1 %1655, %v21_v11   ;;  %33 = vperm.xlu0 %1654, %v20_v12  }
  0x1a   :  { %42 = vperm.xlu1 %1655, %v23_v13   ;;  %39 = vperm.xlu0 %1654, %v22_v14  }
  0x1e   :  { %48 = vperm.xlu1 %1655, %v25_v15   ;;  %45 = vperm.xlu0 %1654, %v24_v16  }
  0x81   :  { %v84_v23 = vpop.permute.xlu1 %83  ;;  %v78_v24 = vpop.permute.xlu0 %77 }
  0x82   :  { %v102_v25 = vsub.s32 %v1756_v21, %v84_v23  ;;  %v1762_v27 = vsub.s32 %v1756_v21, %v78_v24 }
  0x84   :  { %vm110_vm0 = vcmp.eq.s32.totalorder %v102_v25, 0  ;;  %vm126_vm1 = vcmp.eq.s32.totalorder %v102_v25, 1  ;;  %vm108_vm2 = vcmp.eq.s32.totalorder %v1762_v27, 0  ;;  %vm124_vm3 = vcmp.eq.s32.totalorder %v1762_v27, 1 }
  0x85   :  { %v118_v29 = vsel %vm110_vm0, 101, %v1682_v28  ;;  %v598_v30 = vsel %vm110_vm0, 201, %v1682_v28  ;;  %v1062_v31 = vsel %vm110_vm0, 301, %v1682_v28  ;;  %v116_v32 = vsel %vm108_vm2, 101, %v1682_v28  ;;  %v87_v10 = vpop.permute.xlu1 %86 }
  0x86   :  { %v134_v33 = vsel %vm126_vm1, 102, %v118_v29  ;;  %v702_v34 = vcombine.high %v598_v30, %v598_v30  ;;  %v709_v35 = vrot.slane %v598_v30, %v1759_v26  ;;  %v1070_v36 = vsel %vm126_vm1, 302, %v1062_v31 }
  0x87   :  { %v238_v37 = vcombine.high %v134_v33, %v134_v33  ;;  %v245_v38 = vrot.slane %v134_v33, %v1759_v26  ;;  %v1174_v39 = vcombine.high %v1070_v36, %v1070_v36  ;;  %v1181_v40 = vrot.slane %v1070_v36, %v1759_v26 }
  0x88   :  { %v716_v41 = vrot.slane %v702_v34, %v1759_v26  ;;  %v717_v42 = vcombine.high %v709_v35, %v709_v35  ;;  %v725_v43 = vrot.slane %v709_v35, %v1759_v26  ;;  %1592 = vst.sshfl [vmem:[%s2650_s3 + $0x41] sm:$0x1 pattern:$0x73625140] %v709_v35  ;;  %v132_v44 = vsel %vm124_vm3, 102, %v116_v32 }
  0x89   :  { %v252_v45 = vrot.slane %v238_v37, %v1759_v26  ;;  %v253_v46 = vcombine.high %v245_v38, %v245_v38  ;;  %v261_v47 = vrot.slane %v245_v38, %v1759_v26  ;;  %1560 = vst.sshfl [vmem:[%s2650_s3 + $0x40] sm:$0x1 pattern:$0x73625140] %v245_v38  ;;  %v1188_v48 = vrot.slane %v1174_v39, %v1759_v26 }
  0x8a   :  { %1624 = vst.sshfl [vmem:[%s2650_s3 + $0x42] sm:$0x1 pattern:$0x73625140] %v1181_v40  ;;  %v718_v49 = vcombine.high %v716_v41, %v716_v41  ;;  %v732_v50 = vrot.slane %v716_v41, %v1759_v26  ;;  %v739_v51 = vrot.slane %v717_v42, %v1759_v26  ;;  %v747_v52 = vcombine.high %v725_v43, %v725_v43 }
  0x8b   :  { %1593 = vst.sshfl [vmem:[%s2650_s3 + $0x45] sm:$0x1 pattern:$0x73625140] %v717_v42  ;;  %v254_v53 = vcombine.high %v252_v45, %v252_v45  ;;  %v268_v54 = vrot.slane %v252_v45, %v1759_v26  ;;  %v275_v55 = vrot.slane %v253_v46, %v1759_v26  ;;  %v283_v56 = vcombine.high %v261_v47, %v261_v47 }
  0x8c   :  { %1594 = vst.sshfl [vmem:[%s2650_s3 + $0x51] sm:$0x1 pattern:$0x73625140] %v716_v41  ;;  %v746_v57 = vrot.slane %v718_v49, %v1759_v26  ;;  %v748_v58 = vcombine.high %v732_v50, %v732_v50  ;;  %v749_v59 = vcombine.high %v739_v51, %v739_v51  ;;  %1014 = vst [vmem:[%s2650_s3 + $0x49] sm:$0x1] %v747_v52 }
  0x8d   :  { %1561 = vst.sshfl [vmem:[%s2650_s3 + $0x44] sm:$0x1 pattern:$0x73625140] %v253_v46  ;;  %v1189_v60 = vcombine.high %v1181_v40, %v1181_v40  ;;  %v282_v61 = vrot.slane %v254_v53, %v1759_v26  ;;  %v284_v62 = vcombine.high %v268_v54, %v268_v54  ;;  %v285_v63 = vcombine.high %v275_v55, %v275_v55 }
  0x8e   :  { %1562 = vst.sshfl [vmem:[%s2650_s3 + $0x50] sm:$0x1 pattern:$0x73625140] %v252_v45  ;;  %550 = vst [vmem:[%s2650_s3 + $0x48] sm:$0x1] %v283_v56  ;;  %v1190_v0 = vcombine.high %v1188_v48, %v1188_v48  ;;  %v750_v1 = vcombine.high %v746_v57, %v746_v57  ;;  %v1197_v3 = vrot.slane %v1181_v40, %v1759_v26 }
  0x8f   :  { %1626 = vst.sshfl [vmem:[%s2650_s3 + $0x52] sm:$0x1 pattern:$0x73625140] %v1188_v48  ;;  %1015 = vst [vmem:[%s2650_s3 + $0x4d] sm:$0x1] %v749_v59  ;;  %v1204_v4 = vrot.slane %v1188_v48, %v1759_v26  ;;  %v1211_v5 = vrot.slane %v1189_v60, %v1759_v26  ;;  %v286_v6 = vcombine.high %v282_v61, %v282_v61 }
  0x90   :  { %1595 = vst.sshfl [vmem:[%s2650_s3 + $0x55] sm:$0x1 pattern:$0x73625140] %v718_v49  ;;  %1018 = vst [vmem:[%s2650_s3 + $0x59] sm:$0x1] %v748_v58  ;;  %v1218_v7 = vrot.slane %v1190_v0, %v1759_v26  ;;  %v140_v8 = vcombine.high %v132_v44, %v132_v44  ;;  %v147_v9 = vrot.slane %v132_v44, %v1759_v26 }
  0x91   :  { %1563 = vst.sshfl [vmem:[%s2650_s3 + $0x54] sm:$0x1 pattern:$0x73625140] %v254_v53  ;;  %551 = vst [vmem:[%s2650_s3 + $0x4c] sm:$0x1] %v285_v63  ;;  %v1219_v11 = vcombine.high %v1197_v3, %v1197_v3  ;;  %v1220_v12 = vcombine.high %v1204_v4, %v1204_v4  ;;  %v1221_v13 = vcombine.high %v1211_v5, %v1211_v5  ;;  %v81_v5 = vpop.permute.xlu0 %80 }
  0x92   :  { %1625 = vst.sshfl [vmem:[%s2650_s3 + $0x46] sm:$0x1 pattern:$0x73625140] %v1189_v60  ;;  %554 = vst [vmem:[%s2650_s3 + $0x58] sm:$0x1] %v284_v62  ;;  %v1222_v15 = vcombine.high %v1218_v7, %v1218_v7  ;;  %v154_v16 = vrot.slane %v140_v8, %v1759_v26  ;;  %v155_v17 = vcombine.high %v147_v9, %v147_v9 }
  0x93   :  { %1627 = vst.sshfl [vmem:[%s2650_s3 + $0x56] sm:$0x1 pattern:$0x73625140] %v1190_v0  ;;  %1019 = vst [vmem:[%s2650_s3 + $0x5d] sm:$0x1] %v750_v1  ;;  %v163_v18 = vrot.slane %v147_v9, %v1759_v26  ;;  %v103_v23 = vsub.s32 %v1756_v21, %v87_v10 }
  0x94   :  { %v596_v14 = vsel %vm108_vm2, 201, %v1682_v28  ;;  %555 = vst [vmem:[%s2650_s3 + $0x5c] sm:$0x1] %v286_v6  ;;  %1552 = vst.sshfl [vmem:[%s2650_s3] sm:$0x1 pattern:$0x73625140] %v147_v9  ;;  %v156_v24 = vcombine.high %v154_v16, %v154_v16  ;;  %v170_v25 = vrot.slane %v154_v16, %v1759_v26  ;;  %v177_v29 = vrot.slane %v155_v17, %v1759_v26 }
  0x95   :  { %1486 = vst [vmem:[%s2650_s3 + $0x4a] sm:$0x1] %v1219_v11  ;;  %1487 = vst [vmem:[%s2650_s3 + $0x4e] sm:$0x1] %v1221_v13  ;;  %v604_v19 = vcombine.high %v596_v14, %v596_v14  ;;  %v611_v20 = vrot.slane %v596_v14, %v1759_v26  ;;  %v1060_v22 = vsel %vm108_vm2, 301, %v1682_v28  ;;  %v185_v30 = vcombine.high %v163_v18, %v163_v18 }
  0x96   :  { %1490 = vst [vmem:[%s2650_s3 + $0x5a] sm:$0x1] %v1220_v12  ;;  %1491 = vst [vmem:[%s2650_s3 + $0x5e] sm:$0x1] %v1222_v15  ;;  %v1068_v34 = vsel %vm124_vm3, 302, %v1060_v22  ;;  %v184_v35 = vrot.slane %v156_v24, %v1759_v26  ;;  %v186_v36 = vcombine.high %v170_v25, %v170_v25  ;;  %v187_v37 = vcombine.high %v177_v29, %v177_v29 }
  0x97   :  { %1553 = vst.sshfl [vmem:[%s2650_s3 + $0x4] sm:$0x1 pattern:$0x73625140] %v155_v17  ;;  %v618_v31 = vrot.slane %v604_v19, %v1759_v26  ;;  %v619_v32 = vcombine.high %v611_v20, %v611_v20  ;;  %v627_v33 = vrot.slane %v611_v20, %v1759_v26  ;;  %534 = vst [vmem:[%s2650_s3 + $0x8] sm:$0x1] %v185_v30  ;;  %v93_v30 = vpop.permute.xlu1 %92 }
  0x98   :  { %1554 = vst.sshfl [vmem:[%s2650_s3 + $0x10] sm:$0x1 pattern:$0x73625140] %v154_v16  ;;  %v1076_v38 = vcombine.high %v1068_v34, %v1068_v34  ;;  %v188_v42 = vcombine.high %v184_v35, %v184_v35  ;;  %535 = vst [vmem:[%s2650_s3 + $0xc] sm:$0x1] %v187_v37  ;;  %v1083_v43 = vrot.slane %v1068_v34, %v1759_v26  ;;  %v90_v35 = vpop.permute.xlu0 %89 }
  0x99   :  { %1584 = vst.sshfl [vmem:[%s2650_s3 + $0x1] sm:$0x1 pattern:$0x73625140] %v611_v20  ;;  %v620_v39 = vcombine.high %v618_v31, %v618_v31  ;;  %v634_v40 = vrot.slane %v618_v31, %v1759_v26  ;;  %v641_v41 = vrot.slane %v619_v32, %v1759_v26  ;;  %v649_v27 = vcombine.high %v627_v33, %v627_v33 }
  0x9a   :  { %1555 = vst.sshfl [vmem:[%s2650_s3 + $0x14] sm:$0x1 pattern:$0x73625140] %v156_v24  ;;  %538 = vst [vmem:[%s2650_s3 + $0x18] sm:$0x1] %v186_v36  ;;  %v1090_v44 = vrot.slane %v1076_v38, %v1759_v26  ;;  %v1091_v49 = vcombine.high %v1083_v43, %v1083_v43  ;;  %v1099_v51 = vrot.slane %v1083_v43, %v1759_v26 }
  0x9b   :  { %1585 = vst.sshfl [vmem:[%s2650_s3 + $0x5] sm:$0x1 pattern:$0x73625140] %v619_v32  ;;  %vm111_vm4 = vcmp.eq.s32.totalorder %v103_v23, 0  ;;  %v648_v45 = vrot.slane %v620_v39, %v1759_v26  ;;  %v650_v46 = vcombine.high %v634_v40, %v634_v40  ;;  %v651_v47 = vcombine.high %v641_v41, %v641_v41 }
  0x9c   :  { %1586 = vst.sshfl [vmem:[%s2650_s3 + $0x11] sm:$0x1 pattern:$0x73625140] %v618_v31  ;;  %998 = vst [vmem:[%s2650_s3 + $0x9] sm:$0x1] %v649_v27  ;;  %v1092_v50 = vcombine.high %v1090_v44, %v1090_v44  ;;  %v1106_v52 = vrot.slane %v1090_v44, %v1759_v26  ;;  %v1113_v56 = vrot.slane %v1091_v49, %v1759_v26 }
  0x9d   :  { %1587 = vst.sshfl [vmem:[%s2650_s3 + $0x15] sm:$0x1 pattern:$0x73625140] %v620_v39  ;;  %v119_v48 = vsel %vm111_vm4, 101, %v1682_v28  ;;  %v652_v53 = vcombine.high %v648_v45, %v648_v45  ;;  %vm127_vm5 = vcmp.eq.s32.totalorder %v103_v23, 1  ;;  %v1121_v58 = vcombine.high %v1099_v51, %v1099_v51 }
  0x9e   :  { %539 = vst [vmem:[%s2650_s3 + $0x1c] sm:$0x1] %v188_v42  ;;  %1616 = vst.sshfl [vmem:[%s2650_s3 + $0x2] sm:$0x1 pattern:$0x73625140] %v1083_v43  ;;  %v1120_v57 = vrot.slane %v1092_v50, %v1759_v26  ;;  %v1122_v59 = vcombine.high %v1106_v52, %v1106_v52  ;;  %v1123_v0 = vcombine.high %v1113_v56, %v1113_v56 }
  0x9f   :  { %1618 = vst.sshfl [vmem:[%s2650_s3 + $0x12] sm:$0x1 pattern:$0x73625140] %v1090_v44  ;;  %999 = vst [vmem:[%s2650_s3 + $0xd] sm:$0x1] %v651_v47  ;;  %v101_v27 = vsub.s32 %v1756_v21, %v81_v5  ;;  %v2039_v42 = vsub.s32 %v1756_v21, %v93_v30 }
  0xa0   :  { %1002 = vst [vmem:[%s2650_s3 + $0x19] sm:$0x1] %v650_v46  ;;  %v599_v54 = vsel %vm111_vm4, 201, %v1682_v28  ;;  %v1063_v55 = vsel %vm111_vm4, 301, %v1682_v28  ;;  %1003 = vst [vmem:[%s2650_s3 + $0x1d] sm:$0x1] %v652_v53  ;;  %v1124_v1 = vcombine.high %v1120_v57, %v1120_v57  ;;  %v2049_v46 = vsub.s32 %v1756_v21, %v90_v35 }
  0xa1   :  { %1617 = vst.sshfl [vmem:[%s2650_s3 + $0x6] sm:$0x1 pattern:$0x73625140] %v1091_v49  ;;  %v135_v60 = vsel %vm127_vm5, 102, %v119_v48  ;;  %v751_v61 = vcombine.high %v599_v54, %v599_v54  ;;  %v758_v62 = vrot.slane %v599_v54, %v1759_v26  ;;  %v1071_v63 = vsel %vm127_vm5, 302, %v1063_v55 }
  0xa2   :  { %1619 = vst.sshfl [vmem:[%s2650_s3 + $0x16] sm:$0x1 pattern:$0x73625140] %v1092_v50  ;;  %1470 = vst [vmem:[%s2650_s3 + $0xa] sm:$0x1] %v1121_v58  ;;  %v287_v3 = vcombine.high %v135_v60, %v135_v60  ;;  %v294_v4 = vrot.slane %v135_v60, %v1759_v26  ;;  %v1223_v9 = vcombine.high %v1071_v63, %v1071_v63 }
  0xa3   :  { %1474 = vst [vmem:[%s2650_s3 + $0x1a] sm:$0x1] %v1122_v59  ;;  %v765_v6 = vrot.slane %v751_v61, %v1759_v26  ;;  %v766_v7 = vcombine.high %v758_v62, %v758_v62  ;;  %v774_v8 = vrot.slane %v758_v62, %v1759_v26  ;;  %1596 = vst.sshfl [vmem:[%s2650_s3 + $0x61] sm:$0x1 pattern:$0x73625140] %v758_v62 }
  0xa4   :  { %1471 = vst [vmem:[%s2650_s3 + $0xe] sm:$0x1] %v1123_v0  ;;  %1475 = vst [vmem:[%s2650_s3 + $0x1e] sm:$0x1] %v1124_v1  ;;  %v301_v10 = vrot.slane %v287_v3, %v1759_v26  ;;  %v302_v11 = vcombine.high %v294_v4, %v294_v4  ;;  %v310_v12 = vrot.slane %v294_v4, %v1759_v26  ;;  %vm109_vm6 = vcmp.eq.s32.totalorder %v101_v27, 0 }
  0xa5   :  { %1564 = vst.sshfl [vmem:[%s2650_s3 + $0x60] sm:$0x1 pattern:$0x73625140] %v294_v4  ;;  %v1230_v13 = vrot.slane %v1071_v63, %v1759_v26  ;;  %v767_v14 = vcombine.high %v765_v6, %v765_v6  ;;  %v781_v15 = vrot.slane %v765_v6, %v1759_v26  ;;  %v788_v16 = vrot.slane %v766_v7, %v1759_v26 }
  0xa6   :  { %v796_v17 = vcombine.high %v774_v8, %v774_v8  ;;  %1597 = vst.sshfl [vmem:[%s2650_s3 + $0x65] sm:$0x1 pattern:$0x73625140] %v766_v7  ;;  %v303_v18 = vcombine.high %v301_v10, %v301_v10  ;;  %v317_v19 = vrot.slane %v301_v10, %v1759_v26  ;;  %v324_v20 = vrot.slane %v302_v11, %v1759_v26 }
  0xa7   :  { %1598 = vst.sshfl [vmem:[%s2650_s3 + $0x71] sm:$0x1 pattern:$0x73625140] %v765_v6  ;;  %v332_v22 = vcombine.high %v310_v12, %v310_v12  ;;  %v795_v23 = vrot.slane %v767_v14, %v1759_v26  ;;  %v797_v24 = vcombine.high %v781_v15, %v781_v15  ;;  %v798_v25 = vcombine.high %v788_v16, %v788_v16 }
  0xa8   :  { %1565 = vst.sshfl [vmem:[%s2650_s3 + $0x64] sm:$0x1 pattern:$0x73625140] %v302_v11  ;;  %1022 = vst [vmem:[%s2650_s3 + $0x69] sm:$0x1] %v796_v17  ;;  %v1237_v29 = vrot.slane %v1223_v9, %v1759_v26  ;;  %v331_v31 = vrot.slane %v303_v18, %v1759_v26  ;;  %v333_v32 = vcombine.high %v317_v19, %v317_v19 }
  0xa9   :  { %1566 = vst.sshfl [vmem:[%s2650_s3 + $0x70] sm:$0x1 pattern:$0x73625140] %v301_v10  ;;  %v334_v33 = vcombine.high %v324_v20, %v324_v20  ;;  %558 = vst [vmem:[%s2650_s3 + $0x68] sm:$0x1] %v332_v22  ;;  %v1238_v34 = vcombine.high %v1230_v13, %v1230_v13  ;;  %v799_v36 = vcombine.high %v795_v23, %v795_v23 }
  0xaa   :  { %1628 = vst.sshfl [vmem:[%s2650_s3 + $0x62] sm:$0x1 pattern:$0x73625140] %v1230_v13  ;;  %1023 = vst [vmem:[%s2650_s3 + $0x6d] sm:$0x1] %v798_v25  ;;  %v1239_v37 = vcombine.high %v1237_v29, %v1237_v29  ;;  %v1246_v38 = vrot.slane %v1230_v13, %v1759_v26  ;;  %v1253_v39 = vrot.slane %v1237_v29, %v1759_v26 }
  0xab   :  { %1599 = vst.sshfl [vmem:[%s2650_s3 + $0x75] sm:$0x1 pattern:$0x73625140] %v767_v14  ;;  %1026 = vst [vmem:[%s2650_s3 + $0x79] sm:$0x1] %v797_v24  ;;  %v335_v40 = vcombine.high %v331_v31, %v331_v31  ;;  %v1260_v41 = vrot.slane %v1238_v34, %v1759_v26 }
  0xac   :  { %1567 = vst.sshfl [vmem:[%s2650_s3 + $0x74] sm:$0x1 pattern:$0x73625140] %v303_v18  ;;  %559 = vst [vmem:[%s2650_s3 + $0x6c] sm:$0x1] %v334_v33  ;;  %v1267_v43 = vrot.slane %v1239_v37, %v1759_v26  ;;  %v1268_v44 = vcombine.high %v1246_v38, %v1246_v38  ;;  %v1269_v45 = vcombine.high %v1253_v39, %v1253_v39 }
  0xad   :  { %1630 = vst.sshfl [vmem:[%s2650_s3 + $0x72] sm:$0x1 pattern:$0x73625140] %v1237_v29  ;;  %562 = vst [vmem:[%s2650_s3 + $0x78] sm:$0x1] %v333_v32  ;;  %v1270_v47 = vcombine.high %v1260_v41, %v1260_v41 }
  0xae   :  { %1629 = vst.sshfl [vmem:[%s2650_s3 + $0x66] sm:$0x1 pattern:$0x73625140] %v1238_v34  ;;  %1027 = vst [vmem:[%s2650_s3 + $0x7d] sm:$0x1] %v799_v36  ;;  %v1271_v48 = vcombine.high %v1267_v43, %v1267_v43 }
  0xaf   :  { %1631 = vst.sshfl [vmem:[%s2650_s3 + $0x76] sm:$0x1 pattern:$0x73625140] %v1239_v37  ;;  %563 = vst [vmem:[%s2650_s3 + $0x7c] sm:$0x1] %v335_v40 }
  0xb0   :  { %vm125_vm7 = vcmp.eq.s32.totalorder %v101_v27, 1  ;;  %vm113_vm8 = vcmp.eq.s32.totalorder %v2039_v42, 0  ;;  %1494 = vst [vmem:[%s2650_s3 + $0x6a] sm:$0x1] %v1268_v44  ;;  %1498 = vst [vmem:[%s2650_s3 + $0x7a] sm:$0x1] %v1269_v45 }
  0xb1   :  { %v117_v49 = vsel %vm109_vm6, 101, %v1682_v28  ;;  %v597_v50 = vsel %vm109_vm6, 201, %v1682_v28  ;;  %v1061_v51 = vsel %vm109_vm6, 301, %v1682_v28  ;;  %1495 = vst [vmem:[%s2650_s3 + $0x6e] sm:$0x1] %v1270_v47  ;;  %v121_v63 = vsel %vm113_vm8, 101, %v1682_v28 }
  0xb2   :  { %v133_v52 = vsel %vm125_vm7, 102, %v117_v49  ;;  %v653_v53 = vcombine.high %v597_v50, %v597_v50  ;;  %v660_v54 = vrot.slane %v597_v50, %v1759_v26  ;;  %v1069_v55 = vsel %vm125_vm7, 302, %v1061_v51  ;;  %1499 = vst [vmem:[%s2650_s3 + $0x7e] sm:$0x1] %v1271_v48 }
  0xb3   :  { %v189_v56 = vcombine.high %v133_v52, %v133_v52  ;;  %v196_v57 = vrot.slane %v133_v52, %v1759_v26  ;;  %v1125_v58 = vcombine.high %v1069_v55, %v1069_v55  ;;  %v1132_v59 = vrot.slane %v1069_v55, %v1759_v26 }
  0xb4   :  { %v667_v60 = vrot.slane %v653_v53, %v1759_v26  ;;  %v668_v61 = vcombine.high %v660_v54, %v660_v54  ;;  %v676_v62 = vrot.slane %v660_v54, %v1759_v26  ;;  %1588 = vst.sshfl [vmem:[%s2650_s3 + $0x21] sm:$0x1 pattern:$0x73625140] %v660_v54  ;;  %vm129_vm9 = vcmp.eq.s32.totalorder %v2039_v42, 1 }
  0xb5   :  { %v203_v0 = vrot.slane %v189_v56, %v1759_v26  ;;  %v204_v1 = vcombine.high %v196_v57, %v196_v57  ;;  %v212_v3 = vrot.slane %v196_v57, %v1759_v26  ;;  %1556 = vst.sshfl [vmem:[%s2650_s3 + $0x20] sm:$0x1 pattern:$0x73625140] %v196_v57  ;;  %v1139_v4 = vrot.slane %v1125_v58, %v1759_v26 }
  0xb6   :  { %1620 = vst.sshfl [vmem:[%s2650_s3 + $0x22] sm:$0x1 pattern:$0x73625140] %v1132_v59  ;;  %v669_v5 = vcombine.high %v667_v60, %v667_v60  ;;  %v683_v6 = vrot.slane %v667_v60, %v1759_v26  ;;  %v690_v7 = vrot.slane %v668_v61, %v1759_v26  ;;  %v698_v8 = vcombine.high %v676_v62, %v676_v62 }
  0xb7   :  { %1589 = vst.sshfl [vmem:[%s2650_s3 + $0x25] sm:$0x1 pattern:$0x73625140] %v668_v61  ;;  %v205_v9 = vcombine.high %v203_v0, %v203_v0  ;;  %v219_v10 = vrot.slane %v203_v0, %v1759_v26  ;;  %v226_v11 = vrot.slane %v204_v1, %v1759_v26  ;;  %v234_v12 = vcombine.high %v212_v3, %v212_v3 }
  0xb8   :  { %1590 = vst.sshfl [vmem:[%s2650_s3 + $0x31] sm:$0x1 pattern:$0x73625140] %v667_v60  ;;  %v697_v13 = vrot.slane %v669_v5, %v1759_v26  ;;  %v699_v14 = vcombine.high %v683_v6, %v683_v6  ;;  %v700_v15 = vcombine.high %v690_v7, %v690_v7  ;;  %1006 = vst [vmem:[%s2650_s3 + $0x29] sm:$0x1] %v698_v8 }
  0xb9   :  { %1557 = vst.sshfl [vmem:[%s2650_s3 + $0x24] sm:$0x1 pattern:$0x73625140] %v204_v1  ;;  %v1140_v16 = vcombine.high %v1132_v59, %v1132_v59  ;;  %v233_v17 = vrot.slane %v205_v9, %v1759_v26  ;;  %v235_v18 = vcombine.high %v219_v10, %v219_v10  ;;  %v236_v19 = vcombine.high %v226_v11, %v226_v11 }
  0xba   :  { %1558 = vst.sshfl [vmem:[%s2650_s3 + $0x30] sm:$0x1 pattern:$0x73625140] %v203_v0  ;;  %542 = vst [vmem:[%s2650_s3 + $0x28] sm:$0x1] %v234_v12  ;;  %v1141_v20 = vcombine.high %v1139_v4, %v1139_v4  ;;  %v701_v22 = vcombine.high %v697_v13, %v697_v13  ;;  %v1148_v23 = vrot.slane %v1132_v59, %v1759_v26 }
  0xbb   :  { %1622 = vst.sshfl [vmem:[%s2650_s3 + $0x32] sm:$0x1 pattern:$0x73625140] %v1139_v4  ;;  %1007 = vst [vmem:[%s2650_s3 + $0x2d] sm:$0x1] %v700_v15  ;;  %v1155_v24 = vrot.slane %v1139_v4, %v1759_v26  ;;  %v1162_v25 = vrot.slane %v1140_v16, %v1759_v26  ;;  %v237_v29 = vcombine.high %v233_v17, %v233_v17 }
  0xbc   :  { %1591 = vst.sshfl [vmem:[%s2650_s3 + $0x35] sm:$0x1 pattern:$0x73625140] %v669_v5  ;;  %1010 = vst [vmem:[%s2650_s3 + $0x39] sm:$0x1] %v699_v14  ;;  %v1169_v30 = vrot.slane %v1141_v20, %v1759_v26  ;;  %v1170_v32 = vcombine.high %v1148_v23, %v1148_v23 }
  0xbd   :  { %1559 = vst.sshfl [vmem:[%s2650_s3 + $0x34] sm:$0x1 pattern:$0x73625140] %v205_v9  ;;  %543 = vst [vmem:[%s2650_s3 + $0x2c] sm:$0x1] %v236_v19  ;;  %v1171_v33 = vcombine.high %v1155_v24, %v1155_v24  ;;  %v1172_v34 = vcombine.high %v1162_v25, %v1162_v25 }
  0xbe   :  { %1621 = vst.sshfl [vmem:[%s2650_s3 + $0x26] sm:$0x1 pattern:$0x73625140] %v1140_v16  ;;  %546 = vst [vmem:[%s2650_s3 + $0x38] sm:$0x1] %v235_v18  ;;  %v1173_v36 = vcombine.high %v1169_v30, %v1169_v30 }
  0xbf   :  { %1623 = vst.sshfl [vmem:[%s2650_s3 + $0x36] sm:$0x1 pattern:$0x73625140] %v1141_v20  ;;  %v601_v31 = vsel %vm113_vm8, 201, %v1682_v28  ;;  %v137_v35 = vsel %vm129_vm9, 102, %v121_v63 }
  0xc0   :  { %1011 = vst [vmem:[%s2650_s3 + $0x3d] sm:$0x1] %v701_v22  ;;  %547 = vst [vmem:[%s2650_s3 + $0x3c] sm:$0x1] %v237_v29  ;;  %v385_v37 = vcombine.high %v137_v35, %v137_v35  ;;  %v392_v38 = vrot.slane %v137_v35, %v1759_v26  ;;  %v849_v39 = vcombine.high %v601_v31, %v601_v31  ;;  %v1065_v41 = vsel %vm113_vm8, 301, %v1682_v28 }
  0xc1   :  { %1478 = vst [vmem:[%s2650_s3 + $0x2a] sm:$0x1] %v1170_v32  ;;  %1479 = vst [vmem:[%s2650_s3 + $0x2e] sm:$0x1] %v1172_v34  ;;  %v856_v40 = vrot.slane %v601_v31, %v1759_v26  ;;  %vm112_vm10 = vcmp.eq.s32.totalorder %v2049_v46, 0  ;;  %vm128_vm11 = vcmp.eq.s32.totalorder %v2049_v46, 1 }
  0xc2   :  { %1482 = vst [vmem:[%s2650_s3 + $0x3a] sm:$0x1] %v1171_v33  ;;  %1483 = vst [vmem:[%s2650_s3 + $0x3e] sm:$0x1] %v1173_v36  ;;  %v399_v27 = vrot.slane %v385_v37, %v1759_v26  ;;  %v400_v43 = vcombine.high %v392_v38, %v392_v38  ;;  %v408_v44 = vrot.slane %v392_v38, %v1759_v26  ;;  %v1073_v49 = vsel %vm129_vm9, 302, %v1065_v41 }
  0xc3   :  { %1572 = vst.sshfl [vmem:[%s2650_s3 + $0xa0] sm:$0x1 pattern:$0x73625140] %v392_v38  ;;  %v863_v45 = vrot.slane %v849_v39, %v1759_v26  ;;  %v864_v47 = vcombine.high %v856_v40, %v856_v40  ;;  %v872_v48 = vrot.slane %v856_v40, %v1759_v26  ;;  %v120_v50 = vsel %vm112_vm10, 101, %v1682_v28 }
  0xc4   :  { %1604 = vst.sshfl [vmem:[%s2650_s3 + $0xa1] sm:$0x1 pattern:$0x73625140] %v856_v40  ;;  %v401_v51 = vcombine.high %v399_v27, %v399_v27  ;;  %v415_v52 = vrot.slane %v399_v27, %v1759_v26  ;;  %v422_v53 = vrot.slane %v400_v43, %v1759_v26  ;;  %v430_v54 = vcombine.high %v408_v44, %v408_v44  ;;  %v96_v44 = vpop.permute.xlu0 %95 }
  0xc5   :  { %1573 = vst.sshfl [vmem:[%s2650_s3 + $0xa4] sm:$0x1 pattern:$0x73625140] %v400_v43  ;;  %v865_v42 = vcombine.high %v863_v45, %v863_v45  ;;  %v879_v55 = vrot.slane %v863_v45, %v1759_v26  ;;  %v886_v56 = vrot.slane %v864_v47, %v1759_v26  ;;  %v894_v57 = vcombine.high %v872_v48, %v872_v48  ;;  %v99_v43 = vpop.permute.xlu1 %98 }
  0xc6   :  { %1574 = vst.sshfl [vmem:[%s2650_s3 + $0xb0] sm:$0x1 pattern:$0x73625140] %v399_v27  ;;  %v429_v58 = vrot.slane %v401_v51, %v1759_v26  ;;  %v431_v59 = vcombine.high %v415_v52, %v415_v52  ;;  %v432_v60 = vcombine.high %v422_v53, %v422_v53  ;;  %574 = vst [vmem:[%s2650_s3 + $0xa8] sm:$0x1] %v430_v54 }
  0xc7   :  { %1606 = vst.sshfl [vmem:[%s2650_s3 + $0xb1] sm:$0x1 pattern:$0x73625140] %v863_v45  ;;  %v1321_v61 = vcombine.high %v1073_v49, %v1073_v49  ;;  %v893_v62 = vrot.slane %v865_v42, %v1759_v26  ;;  %v895_v63 = vcombine.high %v879_v55, %v879_v55  ;;  %v896_v0 = vcombine.high %v886_v56, %v886_v56 }
  0xc8   :  { %1605 = vst.sshfl [vmem:[%s2650_s3 + $0xa5] sm:$0x1 pattern:$0x73625140] %v864_v47  ;;  %1038 = vst [vmem:[%s2650_s3 + $0xa9] sm:$0x1] %v894_v57  ;;  %v1328_v1 = vrot.slane %v1073_v49, %v1759_v26  ;;  %v433_v3 = vcombine.high %v429_v58, %v429_v58  ;;  %v107_v46 = vsub.s32 %v1756_v21, %v99_v43 }
  0xc9   :  { %1575 = vst.sshfl [vmem:[%s2650_s3 + $0xb4] sm:$0x1 pattern:$0x73625140] %v401_v51  ;;  %575 = vst [vmem:[%s2650_s3 + $0xac] sm:$0x1] %v432_v60  ;;  %v1335_v4 = vrot.slane %v1321_v61, %v1759_v26  ;;  %v897_v7 = vcombine.high %v893_v62, %v893_v62 }
  0xca   :  { %1607 = vst.sshfl [vmem:[%s2650_s3 + $0xb5] sm:$0x1 pattern:$0x73625140] %v865_v42  ;;  %578 = vst [vmem:[%s2650_s3 + $0xb8] sm:$0x1] %v431_v59  ;;  %v1336_v8 = vcombine.high %v1328_v1, %v1328_v1  ;;  %v1344_v9 = vrot.slane %v1328_v1, %v1759_v26  ;;  %v2333_v42 = vsub.s32 %v1756_v21, %v96_v44 }
  0xcb   :  { %v136_v5 = vsel %vm128_vm11, 102, %v120_v50  ;;  %v600_v6 = vsel %vm112_vm10, 201, %v1682_v28  ;;  %1039 = vst [vmem:[%s2650_s3 + $0xad] sm:$0x1] %v896_v0  ;;  %1042 = vst [vmem:[%s2650_s3 + $0xb9] sm:$0x1] %v895_v63  ;;  %v1337_v11 = vcombine.high %v1335_v4, %v1335_v4  ;;  %v1351_v12 = vrot.slane %v1335_v4, %v1759_v26 }
  0xcc   :  { %1636 = vst.sshfl [vmem:[%s2650_s3 + $0xa2] sm:$0x1 pattern:$0x73625140] %v1328_v1  ;;  %v336_v10 = vcombine.high %v136_v5, %v136_v5  ;;  %579 = vst [vmem:[%s2650_s3 + $0xbc] sm:$0x1] %v433_v3  ;;  %v343_v13 = vrot.slane %v136_v5, %v1759_v26  ;;  %v800_v14 = vcombine.high %v600_v6, %v600_v6 }
  0xcd   :  { %1638 = vst.sshfl [vmem:[%s2650_s3 + $0xb2] sm:$0x1 pattern:$0x73625140] %v1335_v4  ;;  %1043 = vst [vmem:[%s2650_s3 + $0xbd] sm:$0x1] %v897_v7  ;;  %v1358_v15 = vrot.slane %v1336_v8, %v1759_v26  ;;  %v1366_v16 = vcombine.high %v1344_v9, %v1344_v9  ;;  %v807_v18 = vrot.slane %v600_v6, %v1759_v26  ;;  %v2373_v7 = vpop.permute.xlu1 %30 }
  0xce   :  { %1637 = vst.sshfl [vmem:[%s2650_s3 + $0xa6] sm:$0x1 pattern:$0x73625140] %v1336_v8  ;;  %v350_v17 = vrot.slane %v336_v10, %v1759_v26  ;;  %v1365_v19 = vrot.slane %v1337_v11, %v1759_v26  ;;  %v1367_v20 = vcombine.high %v1351_v12, %v1351_v12  ;;  %v351_v22 = vcombine.high %v343_v13, %v343_v13  ;;  %v2375_v8 = vpop.permute.xlu0 %27 }
  0xcf   :  { %1639 = vst.sshfl [vmem:[%s2650_s3 + $0xb6] sm:$0x1 pattern:$0x73625140] %v1337_v11  ;;  %v359_v23 = vrot.slane %v343_v13, %v1759_v26  ;;  %v1368_v24 = vcombine.high %v1358_v15, %v1358_v15  ;;  %1510 = vst [vmem:[%s2650_s3 + $0xaa] sm:$0x1] %v1366_v16  ;;  %v814_v30 = vrot.slane %v800_v14, %v1759_v26 }
  0xd0   :  { %1568 = vst.sshfl [vmem:[%s2650_s3 + $0x80] sm:$0x1 pattern:$0x73625140] %v343_v13  ;;  %v352_v25 = vcombine.high %v350_v17, %v350_v17  ;;  %v366_v29 = vrot.slane %v350_v17, %v1759_v26  ;;  %v1369_v31 = vcombine.high %v1365_v19, %v1365_v19  ;;  %1514 = vst [vmem:[%s2650_s3 + $0xba] sm:$0x1] %v1367_v20 }
  0xd1   :  { %1570 = vst.sshfl [vmem:[%s2650_s3 + $0x90] sm:$0x1 pattern:$0x73625140] %v350_v17  ;;  %v373_v32 = vrot.slane %v351_v22, %v1759_v26  ;;  %v381_v33 = vcombine.high %v359_v23, %v359_v23  ;;  %v815_v34 = vcombine.high %v807_v18, %v807_v18  ;;  %1511 = vst [vmem:[%s2650_s3 + $0xae] sm:$0x1] %v1368_v24 }
  0xd2   :  { %1600 = vst.sshfl [vmem:[%s2650_s3 + $0x81] sm:$0x1 pattern:$0x73625140] %v807_v18  ;;  %v380_v35 = vrot.slane %v352_v25, %v1759_v26  ;;  %v382_v36 = vcombine.high %v366_v29, %v366_v29  ;;  %v816_v37 = vcombine.high %v814_v30, %v814_v30  ;;  %v823_v38 = vrot.slane %v807_v18, %v1759_v26 }
  0xd3   :  { %1569 = vst.sshfl [vmem:[%s2650_s3 + $0x84] sm:$0x1 pattern:$0x73625140] %v351_v22  ;;  %1515 = vst [vmem:[%s2650_s3 + $0xbe] sm:$0x1] %v1369_v31  ;;  %v383_v39 = vcombine.high %v373_v32, %v373_v32  ;;  %v830_v40 = vrot.slane %v814_v30, %v1759_v26  ;;  %v837_v41 = vrot.slane %v815_v34, %v1759_v26 }
  0xd4   :  { %1571 = vst.sshfl [vmem:[%s2650_s3 + $0x94] sm:$0x1 pattern:$0x73625140] %v352_v25  ;;  %566 = vst [vmem:[%s2650_s3 + $0x88] sm:$0x1] %v381_v33  ;;  %v384_v45 = vcombine.high %v380_v35, %v380_v35  ;;  %v844_v47 = vrot.slane %v816_v37, %v1759_v26  ;;  %v845_v48 = vcombine.high %v823_v38, %v823_v38  ;;  %v2430_v38 = vpop.permute.xlu0 %33 }
  0xd5   :  { %1602 = vst.sshfl [vmem:[%s2650_s3 + $0x91] sm:$0x1 pattern:$0x73625140] %v814_v30  ;;  %v1064_v27 = vsel %vm112_vm10, 301, %v1682_v28  ;;  %v846_v50 = vcombine.high %v830_v40, %v830_v40  ;;  %v847_v51 = vcombine.high %v837_v41, %v837_v41  ;;  %vm115_vm12 = vcmp.eq.s32.totalorder %v107_v46, 0 }
  0xd6   :  { %1601 = vst.sshfl [vmem:[%s2650_s3 + $0x85] sm:$0x1 pattern:$0x73625140] %v815_v34  ;;  %570 = vst [vmem:[%s2650_s3 + $0x98] sm:$0x1] %v382_v36  ;;  %v848_v54 = vcombine.high %v844_v47, %v844_v47  ;;  %vm51_vm0 = vcmp.lt.s32.totalorder %v1756_v21, %v2373_v7  ;;  %vm50_vm1 = vcmp.lt.s32.totalorder %v1756_v21, %v2375_v8 }
  0xd7   :  { %1603 = vst.sshfl [vmem:[%s2650_s3 + $0x95] sm:$0x1 pattern:$0x73625140] %v816_v37  ;;  %v1072_v49 = vsel %vm128_vm11, 302, %v1064_v27  ;;  %vm131_vm13 = vcmp.eq.s32.totalorder %v107_v46, 1  ;;  %v2428_v37 = vpop.permute.xlu1 %36  ;;  %vm2569_vm3 = vmpackc.low %vm51_vm0, %vm50_vm1  ;;  %vm52_vm4 = vcmp.lt.s32.totalorder %v1756_v21, %v2430_v38 }
  0xd8   :  { %567 = vst [vmem:[%s2650_s3 + $0x8c] sm:$0x1] %v383_v39  ;;  %v1272_v52 = vcombine.high %v1072_v49, %v1072_v49  ;;  %v1279_v53 = vrot.slane %v1072_v49, %v1759_v26  ;;  %571 = vst [vmem:[%s2650_s3 + $0x9c] sm:$0x1] %v384_v45  ;;  %vm114_vm14 = vcmp.eq.s32.totalorder %v2333_v42, 0  ;;  %vm130_vm15 = vcmp.eq.s32.totalorder %v2333_v42, 1 }
  0xd9   :  { %1030 = vst [vmem:[%s2650_s3 + $0x89] sm:$0x1] %v845_v48  ;;  %1031 = vst [vmem:[%s2650_s3 + $0x8d] sm:$0x1] %v847_v51  ;;  %v123_v62 = vsel %vm115_vm12, 101, %v1682_v28  ;;  %v603_v63 = vsel %vm115_vm12, 201, %v1682_v28  ;;  %vm53_vm2 = vcmp.lt.s32.totalorder %v1756_v21, %v2428_v37 }
  0xda   :  { %1034 = vst [vmem:[%s2650_s3 + $0x99] sm:$0x1] %v846_v50  ;;  %v1286_v55 = vrot.slane %v1272_v52, %v1759_v26  ;;  %v1287_v56 = vcombine.high %v1279_v53, %v1279_v53  ;;  %v1295_v57 = vrot.slane %v1279_v53, %v1759_v26  ;;  %1632 = vst.sshfl [vmem:[%s2650_s3 + $0x82] sm:$0x1 pattern:$0x73625140] %v1279_v53 }
  0xdb   :  { %1035 = vst [vmem:[%s2650_s3 + $0x9d] sm:$0x1] %v848_v54  ;;  %v1067_v0 = vsel %vm115_vm12, 301, %v1682_v28  ;;  %v122_v1 = vsel %vm114_vm14, 101, %v1682_v28  ;;  %v139_v6 = vsel %vm131_vm13, 102, %v123_v62  ;;  %v947_v11 = vcombine.high %v603_v63, %v603_v63  ;;  %vm2588_vm6 = vmpackc.low %vm53_vm2, %vm52_vm4 }
  0xdc   :  { %v1288_v58 = vcombine.high %v1286_v55, %v1286_v55  ;;  %v1302_v59 = vrot.slane %v1286_v55, %v1759_v26  ;;  %v1309_v60 = vrot.slane %v1287_v56, %v1759_v26  ;;  %v1317_v61 = vcombine.high %v1295_v57, %v1295_v57  ;;  %1633 = vst.sshfl [vmem:[%s2650_s3 + $0x86] sm:$0x1 pattern:$0x73625140] %v1287_v56  ;;  %vm60_vm8 = vmpackc.even %vm2588_vm6, %vm2569_vm3 }
  0xdd   :  { %1634 = vst.sshfl [vmem:[%s2650_s3 + $0x92] sm:$0x1 pattern:$0x73625140] %v1286_v55  ;;  %v483_v9 = vcombine.high %v139_v6, %v139_v6  ;;  %v490_v10 = vrot.slane %v139_v6, %v1759_v26  ;;  %v954_v12 = vrot.slane %v603_v63, %v1759_v26  ;;  %v1075_v14 = vsel %vm131_vm13, 302, %v1067_v0  ;;  %v2493_v63 = vpop.permute.xlu1 %42  ;;  %v2495_v0 = vpop.permute.xlu0 %39 }
  0xde   :  { %v1316_v3 = vrot.slane %v1288_v58, %v1759_v26  ;;  %v1318_v4 = vcombine.high %v1302_v59, %v1302_v59  ;;  %v1319_v5 = vcombine.high %v1309_v60, %v1309_v60  ;;  %1502 = vst [vmem:[%s2650_s3 + $0x8a] sm:$0x1] %v1317_v61  ;;  %1635 = vst.sshfl [vmem:[%s2650_s3 + $0x96] sm:$0x1 pattern:$0x73625140] %v1288_v58 }
  0xdf   :  { %v2388_v15 = vsel %vm130_vm15, 102, %v122_v1  ;;  %v2393_v16 = vsel %vm114_vm14, 201, %v1682_v28  ;;  %v497_v17 = vrot.slane %v483_v9, %v1759_v26  ;;  %v498_v18 = vcombine.high %v490_v10, %v490_v10  ;;  %1580 = vst.sshfl [vmem:[%s2650_s3 + $0xe0] sm:$0x1 pattern:$0x73625140] %v490_v10 }
  0xe0   :  { %v1320_v13 = vcombine.high %v1316_v3, %v1316_v3  ;;  %1503 = vst [vmem:[%s2650_s3 + $0x8e] sm:$0x1] %v1319_v5  ;;  %1506 = vst [vmem:[%s2650_s3 + $0x9a] sm:$0x1] %v1318_v4  ;;  %v506_v19 = vrot.slane %v490_v10, %v1759_v26  ;;  %v961_v20 = vrot.slane %v947_v11, %v1759_v26  ;;  %v1066_v5 = vsel %vm114_vm14, 301, %v1682_v28 }
  0xe1   :  { %1612 = vst.sshfl [vmem:[%s2650_s3 + $0xe1] sm:$0x1 pattern:$0x73625140] %v954_v12  ;;  %v962_v22 = vcombine.high %v954_v12, %v954_v12  ;;  %v970_v23 = vrot.slane %v954_v12, %v1759_v26  ;;  %v1419_v24 = vcombine.high %v1075_v14, %v1075_v14  ;;  %v1426_v25 = vrot.slane %v1075_v14, %v1759_v26 }
  0xe2   :  { %1507 = vst [vmem:[%s2650_s3 + $0x9e] sm:$0x1] %v1320_v13  ;;  %v499_v29 = vcombine.high %v497_v17, %v497_v17  ;;  %v513_v30 = vrot.slane %v497_v17, %v1759_v26  ;;  %v520_v31 = vrot.slane %v498_v18, %v1759_v26  ;;  %v528_v32 = vcombine.high %v506_v19, %v506_v19 }
  0xe3   :  { %1581 = vst.sshfl [vmem:[%s2650_s3 + $0xe4] sm:$0x1 pattern:$0x73625140] %v498_v18  ;;  %v963_v33 = vcombine.high %v961_v20, %v961_v20  ;;  %v977_v34 = vrot.slane %v961_v20, %v1759_v26  ;;  %v984_v35 = vrot.slane %v962_v22, %v1759_v26  ;;  %v992_v36 = vcombine.high %v970_v23, %v970_v23 }
  0xe4   :  { %1582 = vst.sshfl [vmem:[%s2650_s3 + $0xf0] sm:$0x1 pattern:$0x73625140] %v497_v17  ;;  %v527_v39 = vrot.slane %v499_v29, %v1759_v26  ;;  %v529_v40 = vcombine.high %v513_v30, %v513_v30  ;;  %v530_v41 = vcombine.high %v520_v31, %v520_v31  ;;  %590 = vst [vmem:[%s2650_s3 + $0xe8] sm:$0x1] %v528_v32  ;;  %v46_v30 = vpop.permute.xlu0 %45 }
  0xe5   :  { %1614 = vst.sshfl [vmem:[%s2650_s3 + $0xf1] sm:$0x1 pattern:$0x73625140] %v961_v20  ;;  %v1433_v27 = vrot.slane %v1419_v24, %v1759_v26  ;;  %v991_v43 = vrot.slane %v963_v33, %v1759_v26  ;;  %v993_v44 = vcombine.high %v977_v34, %v977_v34  ;;  %v994_v45 = vcombine.high %v984_v35, %v984_v35 }
  0xe6   :  { %1613 = vst.sshfl [vmem:[%s2650_s3 + $0xe5] sm:$0x1 pattern:$0x73625140] %v962_v22  ;;  %1054 = vst [vmem:[%s2650_s3 + $0xe9] sm:$0x1] %v992_v36  ;;  %v1434_v47 = vcombine.high %v1426_v25, %v1426_v25  ;;  %v531_v48 = vcombine.high %v527_v39, %v527_v39  ;;  %v1442_v50 = vrot.slane %v1426_v25, %v1759_v26 }
  0xe7   :  { %1644 = vst.sshfl [vmem:[%s2650_s3 + $0xe2] sm:$0x1 pattern:$0x73625140] %v1426_v25  ;;  %591 = vst [vmem:[%s2650_s3 + $0xec] sm:$0x1] %v530_v41  ;;  %v1435_v49 = vcombine.high %v1433_v27, %v1433_v27  ;;  %v1449_v51 = vrot.slane %v1433_v27, %v1759_v26  ;;  %v995_v52 = vcombine.high %v991_v43, %v991_v43 }
  0xe8   :  { %1583 = vst.sshfl [vmem:[%s2650_s3 + $0xf4] sm:$0x1 pattern:$0x73625140] %v499_v29  ;;  %594 = vst [vmem:[%s2650_s3 + $0xf8] sm:$0x1] %v529_v40  ;;  %v1456_v53 = vrot.slane %v1434_v47, %v1759_v26  ;;  %v434_v54 = vcombine.high %v2388_v15, %v2388_v15  ;;  %v441_v46 = vrot.slane %v2388_v15, %v1759_v26  ;;  %v49_v29 = vpop.permute.xlu1 %48 }
  0xe9   :  { %1615 = vst.sshfl [vmem:[%s2650_s3 + $0xf5] sm:$0x1 pattern:$0x73625140] %v963_v33  ;;  %1055 = vst [vmem:[%s2650_s3 + $0xed] sm:$0x1] %v994_v45  ;;  %v1463_v55 = vrot.slane %v1435_v49, %v1759_v26  ;;  %v1464_v56 = vcombine.high %v1442_v50, %v1442_v50  ;;  %v1465_v57 = vcombine.high %v1449_v51, %v1449_v51 }
  0xea   :  { %1646 = vst.sshfl [vmem:[%s2650_s3 + $0xf2] sm:$0x1 pattern:$0x73625140] %v1433_v27  ;;  %1058 = vst [vmem:[%s2650_s3 + $0xf9] sm:$0x1] %v993_v44  ;;  %v898_v58 = vcombine.high %v2393_v16, %v2393_v16  ;;  %v1466_v59 = vcombine.high %v1456_v53, %v1456_v53  ;;  %v448_v60 = vrot.slane %v434_v54, %v1759_v26 }
  0xeb   :  { %1645 = vst.sshfl [vmem:[%s2650_s3 + $0xe6] sm:$0x1 pattern:$0x73625140] %v1434_v47  ;;  %595 = vst [vmem:[%s2650_s3 + $0xfc] sm:$0x1] %v531_v48  ;;  %v449_v61 = vcombine.high %v441_v46, %v441_v46  ;;  %v457_v62 = vrot.slane %v441_v46, %v1759_v26  ;;  %v1467_v1 = vcombine.high %v1463_v55, %v1463_v55 }
  0xec   :  { %1647 = vst.sshfl [vmem:[%s2650_s3 + $0xf6] sm:$0x1 pattern:$0x73625140] %v1435_v49  ;;  %1059 = vst [vmem:[%s2650_s3 + $0xfd] sm:$0x1] %v995_v52  ;;  %v905_v3 = vrot.slane %v2393_v16, %v1759_v26  ;;  %v912_v4 = vrot.slane %v898_v58, %v1759_v26  ;;  %v450_v6 = vcombine.high %v448_v60, %v448_v60 }
  0xed   :  { %1576 = vst.sshfl [vmem:[%s2650_s3 + $0xc0] sm:$0x1 pattern:$0x73625140] %v441_v46  ;;  %1526 = vst [vmem:[%s2650_s3 + $0xea] sm:$0x1] %v1464_v56  ;;  %v464_v9 = vrot.slane %v448_v60, %v1759_v26  ;;  %v471_v10 = vrot.slane %v449_v61, %v1759_v26  ;;  %v479_v11 = vcombine.high %v457_v62, %v457_v62 }
  0xee   :  { %1530 = vst [vmem:[%s2650_s3 + $0xfa] sm:$0x1] %v1465_v57  ;;  %1527 = vst [vmem:[%s2650_s3 + $0xee] sm:$0x1] %v1466_v59  ;;  %v913_v28 = vcombine.high %v905_v3, %v905_v3  ;;  %v914_v12 = vcombine.high %v912_v4, %v912_v4  ;;  %v921_v13 = vrot.slane %v905_v3, %v1759_v26  ;;  %v1074_v18 = vsel %vm130_vm15, 302, %v1066_v5 }
  0xef   :  { %1577 = vst.sshfl [vmem:[%s2650_s3 + $0xc4] sm:$0x1 pattern:$0x73625140] %v449_v61  ;;  %1531 = vst [vmem:[%s2650_s3 + $0xfe] sm:$0x1] %v1467_v1  ;;  %v928_v14 = vrot.slane %v912_v4, %v1759_v26  ;;  %v478_v15 = vrot.slane %v450_v6, %v1759_v26  ;;  %v480_v16 = vcombine.high %v464_v9, %v464_v9 }
  0xf0   :  { %1578 = vst.sshfl [vmem:[%s2650_s3 + $0xd0] sm:$0x1 pattern:$0x73625140] %v448_v60  ;;  %v481_v17 = vcombine.high %v471_v10, %v471_v10  ;;  %582 = vst [vmem:[%s2650_s3 + $0xc8] sm:$0x1] %v479_v11  ;;  %v935_v19 = vrot.slane %v913_v28, %v1759_v26  ;;  %v942_v20 = vrot.slane %v914_v12, %v1759_v26 }
  0xf1   :  { %1608 = vst.sshfl [vmem:[%s2650_s3 + $0xc1] sm:$0x1 pattern:$0x73625140] %v905_v3  ;;  %v943_v22 = vcombine.high %v921_v13, %v921_v13  ;;  %v944_v23 = vcombine.high %v928_v14, %v928_v14  ;;  %v482_v24 = vcombine.high %v478_v15, %v478_v15  ;;  %586 = vst [vmem:[%s2650_s3 + $0xd8] sm:$0x1] %v480_v16 }
  0xf2   :  { %1610 = vst.sshfl [vmem:[%s2650_s3 + $0xd1] sm:$0x1 pattern:$0x73625140] %v912_v4  ;;  %583 = vst [vmem:[%s2650_s3 + $0xcc] sm:$0x1] %v481_v17  ;;  %v1370_v42 = vcombine.high %v1074_v18, %v1074_v18  ;;  %v1377_v25 = vrot.slane %v1074_v18, %v1759_v26  ;;  %v945_v31 = vcombine.high %v935_v19, %v935_v19 }
  0xf3   :  { %1579 = vst.sshfl [vmem:[%s2650_s3 + $0xd4] sm:$0x1 pattern:$0x73625140] %v450_v6  ;;  %v946_v32 = vcombine.high %v942_v20, %v942_v20  ;;  %1046 = vst [vmem:[%s2650_s3 + $0xc9] sm:$0x1] %v943_v22  ;;  %vm55_vm5 = vcmp.lt.s32.totalorder %v1756_v21, %v2493_v63  ;;  %vm54_vm7 = vcmp.lt.s32.totalorder %v1756_v21, %v2495_v0 }
  0xf4   :  { %1609 = vst.sshfl [vmem:[%s2650_s3 + $0xc5] sm:$0x1 pattern:$0x73625140] %v913_v28  ;;  %1050 = vst [vmem:[%s2650_s3 + $0xd9] sm:$0x1] %v944_v23  ;;  %v1384_v34 = vrot.slane %v1370_v42, %v1759_v26  ;;  %v1385_v8 = vcombine.high %v1377_v25, %v1377_v25  ;;  %v1393_v35 = vrot.slane %v1377_v25, %v1759_v26 }
  0xf5   :  { %1611 = vst.sshfl [vmem:[%s2650_s3 + $0xd5] sm:$0x1 pattern:$0x73625140] %v914_v12  ;;  %587 = vst [vmem:[%s2650_s3 + $0xdc] sm:$0x1] %v482_v24  ;;  %vm57_vm9 = vcmp.lt.s32.totalorder %v1756_v21, %v49_v29  ;;  %vm56_vm10 = vcmp.lt.s32.totalorder %v1756_v21, %v46_v30 }
  0xf6   :  { %1640 = vst.sshfl [vmem:[%s2650_s3 + $0xc2] sm:$0x1 pattern:$0x73625140] %v1377_v25  ;;  %1047 = vst [vmem:[%s2650_s3 + $0xcd] sm:$0x1] %v945_v31  ;;  %v1386_v36 = vcombine.high %v1384_v34, %v1384_v34  ;;  %v1400_v37 = vrot.slane %v1384_v34, %v1759_v26  ;;  %v1407_v38 = vrot.slane %v1385_v8, %v1759_v26 }
  0xf7   :  { %1051 = vst [vmem:[%s2650_s3 + $0xdd] sm:$0x1] %v946_v32  ;;  %v1415_v39 = vcombine.high %v1393_v35, %v1393_v35  ;;  %1641 = vst.sshfl [vmem:[%s2650_s3 + $0xc6] sm:$0x1 pattern:$0x73625140] %v1385_v8 }
  0xf8   :  { %1642 = vst.sshfl [vmem:[%s2650_s3 + $0xd2] sm:$0x1 pattern:$0x73625140] %v1384_v34  ;;  %vm61_vm11 = vmpackc.low %vm55_vm5, %vm54_vm7  ;;  %v64_v40 = vsel %vm60_vm8, 16843009, %v1680_v2  ;;  %v1414_v41 = vrot.slane %v1386_v36, %v1759_v26  ;;  %v1416_v27 = vcombine.high %v1400_v37, %v1400_v37  ;;  %v1417_v43 = vcombine.high %v1407_v38, %v1407_v38 }
  0xf9   :  { %vm62_vm12 = vmpackc.low %vm57_vm9, %vm56_vm10  ;;  %1518 = vst [vmem:[%s2650_s3 + $0xca] sm:$0x1] %v1415_v39 }
  0xfa   :  { %1643 = vst.sshfl [vmem:[%s2650_s3 + $0xd6] sm:$0x1 pattern:$0x73625140] %v1386_v36  ;;  %66 = vst [vmem:[#allocation2] sm:$0xff] %v64_v40  ;;  %v1418_v44 = vcombine.high %v1414_v41, %v1414_v41 }
  0xfb   :  { %vm63_vm13 = vmpackc.even %vm62_vm12, %vm61_vm11  ;;  %1519 = vst [vmem:[%s2650_s3 + $0xce] sm:$0x1] %v1417_v43 }
  0xfc   :  { %v65_v21 = vsel %vm63_vm13, 16843009, %v1680_v2  ;;  %1522 = vst [vmem:[%s2650_s3 + $0xda] sm:$0x1] %v1416_v27 }
  0xfd   :  { %67 = vst [vmem:[#allocation2 + $0x8] sm:$0xff] %v65_v21 }
  0xfe   :  { %1667 = shalt.err (!%p1664_p4)
}
  0xff   :  { %s1668_s25 = scalar_lea.hbm %s2649_s2, 256 }
 0x100   :  { %p1669_p5 = scmp.ne.s32.totalorder %s2649_s2, %s1668_s25  ;;  %p1672_p6 = scmp.lt.u32.totalorder %s1668_s25, %s2649_s2 }
 0x102   :  { %p1674_p7 = pnand %p1672_p6, %p1669_p5 }
 0x104   :  { %1677 = shalt.err (!%p1674_p7)
}
 0x105   :  { %s1684_s30 = smov 128   ;;  %s1685_s4 = smov 8   ;;  %1523 = vst [vmem:[%s2650_s3 + $0xde] sm:$0x1] %v1418_v44 }
 0x106   :  { %1543 = dma.vmem_to_hbm [thread:$0]  %s1538_s10, 256, %s2649_s2, [#allocation3], %s1684_s30, %s1684_s30, %s1685_s4  }
 0x107   :  { %1678 = dma.done.wait [#allocation3], 256  }
 0x108   :  { %1679 = vsyncadd [#allocation3], 4294967040 }
 0x109   :  { %1551 = vsyncpa [#allocation3], 1 }

</bundles_post_ra>
